<compile_context>
chip_gen: v5e
topology: v5e:2x2
jax: 0.10.0
libtpu: 0.0.40
codegen_flags: <defaults>
</compile_context>

<pallas_src>
import numpy as np
import jax
import jax.numpy as jnp
from jax.experimental import pallas as pl
from jax.experimental.pallas import tpu as pltpu

# ---- small synthetic config (consistent with the module's shapes) ----
B, S = 2, 8          # batch, sequence
H = 32               # hidden_size
I = 64               # moe_intermediate_size
E = 8                # n_routed_experts
K = 2                # num_experts_per_tok
G = 4                # group_size == n_fused per fused expert
NG = E // G          # number of fused expert groups
R = 8                # LoRA rank
N_SHARED = 1         # n_shared_experts
I_SHARED = I * N_SHARED
T = B * S
GR = G * R           # 32 LoRA columns per layer
LW = 2 * GR          # 64-lane LoRA width (gate|up concatenated; down zero-padded)

# lane-dense padded sizes (multiples of 128 on the lane axis; padded regions
# are exact zeros, so the math in the padded lanes is identically zero).
HP = 128             # padded hidden
IP = 128             # padded moe intermediate
ISP = 128            # padded shared-experts intermediate


# ---------------------------------------------------------------------------
# Single kernel: shared MLP (g==0 seeds the VMEM accumulator) + one fused
# expert group per grid step; output written once per token tile at g==NG-1.
# All weights are VMEM-resident (constant-index specs), indexed by g in-kernel.
# ---------------------------------------------------------------------------
def _fused_moe_kernel(x_ref, route_ref, scal_ref, wmask_ref,
                      wgu_ref, wd_ref,
                      qagu_ref, qbgu_ref, qad_ref, qbd_ref,
                      swgu_ref, swd_ref,
                      y_ref, acc_ref):
    g = pl.program_id(1)
    last = pl.num_programs(1) - 1

    x_bf = x_ref[...]                              # (TM, HP) bf16
    route = route_ref[0]                           # (TM, LW) f32; cols 0:GR and
                                                   # GR:LW both hold w_i*act_i (rep R)
    scal = scal_ref[0]                             # (TM, 1)  f32 raw routed-weight sum

    # Shared-experts MLP seeds the f32 accumulator once per token tile.
    @pl.when(g == 0)
    def _():
        sgu = jnp.dot(x_bf, swgu_ref[...], preferred_element_type=jnp.float32)
        sg = sgu[:, :ISP]
        su = sgu[:, ISP:]
        sh = (sg * jax.nn.sigmoid(sg)) * su
        acc_ref[...] = jnp.dot(sh.astype(jnp.bfloat16), swd_ref[...],
                               preferred_element_type=jnp.float32)

    # x2 = x + mask_up_proj(w): VPU weighted sum of the G wmask rows
    # (4 broadcast FMAs; no short-K MXU pass).  w_i == route[:, i*R] exactly.
    wmask = wmask_ref[g]                           # (G, HP) f32
    x2 = x_bf.astype(jnp.float32)
    for i in range(G):
        x2 = x2 + route[:, i * R:i * R + 1] * wmask[i:i + 1, :]
    x2_bf = x2.astype(jnp.bfloat16)

    # gate+up fused: one wide base matmul + one wide batched-LoRA pair.
    # qbgu is block-diagonal (gate rows -> gate cols, up rows -> up cols) with
    # 0.1*scaling_factor folded in; route's padded-lane zero contract is carried
    # by the exact-zero pad lanes of the A factors.
    gu = jnp.dot(x2_bf, wgu_ref[g], preferred_element_type=jnp.float32)
    inter = jnp.dot(x2_bf, qagu_ref[g], preferred_element_type=jnp.float32) * route
    gu = gu + jnp.dot(inter.astype(jnp.bfloat16), qbgu_ref[g],
                      preferred_element_type=jnp.float32)
    g_out = gu[:, :IP]
    u_out = gu[:, IP:]
    hmid_bf = ((g_out * jax.nn.sigmoid(g_out)) * u_out).astype(jnp.bfloat16)

    # down projection: base + batched LoRA (A cols GR:LW are exact zeros, so
    # multiplying by the full 64-lane route is safe).
    d = jnp.dot(hmid_bf, wd_ref[g], preferred_element_type=jnp.float32)
    inter_d = jnp.dot(hmid_bf, qad_ref[g], preferred_element_type=jnp.float32) * route
    d = d + jnp.dot(inter_d.astype(jnp.bfloat16), qbd_ref[g],
                    preferred_element_type=jnp.float32)

    acc_ref[...] += scal * d

    @pl.when(g == last)
    def _():
        y_ref[...] = acc_ref[...].astype(y_ref.dtype)


# ---------------------------------------------------------------------------
# One-time weight packing: pre-transpose, zero-pad lane-dense, fuse gate|up,
# batch the LoRA factors (block-diagonal B with 0.1*scaling_factor folded in,
# computed in f32, single bf16 cast), cast to bf16.
# ---------------------------------------------------------------------------
def pack_params(p):
    def pad_to(a, shape):
        return jnp.pad(a, [(0, s - d) for s, d in zip(shape, a.shape)])

    def base_t(w, rows, cols):            # (NG, out, in) -> (NG, rows, cols)
        return pad_to(jnp.swapaxes(w, -1, -2), (NG, rows, cols))

    def a_t(qa, rows):                    # (NG, G, R, in) -> (NG, rows, GR)
        a = jnp.swapaxes(qa.reshape(NG, GR, qa.shape[-1]), -1, -2)
        return pad_to(a, (NG, rows, GR))

    def b_t(qb, sf):                      # (NG,G,out,R),(NG,G,out) -> (NG, GR, out)
        return jnp.swapaxes(0.1 * qb * sf[..., None], -1, -2).reshape(NG, GR, qb.shape[2])

    def sh_t(w, rows, cols):              # (out, in) -> (rows, cols)
        return pad_to(w.T, (rows, cols))

    bf = jnp.bfloat16

    wgu = jnp.concatenate([base_t(p["wg"], HP, IP), base_t(p["wu"], HP, IP)], axis=-1)
    wd = base_t(p["wd"], IP, HP)

    qagu = jnp.concatenate([a_t(p["qag"], HP), a_t(p["qau"], HP)], axis=-1)   # (NG,HP,LW)
    qad = pad_to(a_t(p["qad"], IP), (NG, IP, LW))                             # cols GR:LW = 0

    qbgu = jnp.zeros((NG, LW, 2 * IP), jnp.float32)
    qbgu = qbgu.at[:, :GR, :I].set(b_t(p["qbg"], p["sfg"]))
    qbgu = qbgu.at[:, GR:, IP:IP + I].set(b_t(p["qbu"], p["sfu"]))
    qbd = jnp.zeros((NG, LW, HP), jnp.float32)
    qbd = qbd.at[:, :GR, :H].set(b_t(p["qbd"], p["sfd"]))

    swgu = jnp.concatenate([sh_t(p["s_wg"], HP, ISP), sh_t(p["s_wu"], HP, ISP)], axis=-1)
    swd = sh_t(p["s_wd"], ISP, HP)

    return dict(
        gate_w=p["gate_w"],                                   # f32, wrapper routing
        inv_mapping=p["inv_mapping"],
        wmask_t=pad_to(jnp.swapaxes(p["wmask"], -1, -2), (NG, G, HP)),  # f32 (tiny)
        wgu_t=wgu.astype(bf), wd_t=wd.astype(bf),
        qagu_t=qagu.astype(bf), qbgu_t=qbgu.astype(bf),
        qad_t=qad.astype(bf), qbd_t=qbd.astype(bf),
        swgu_t=swgu.astype(bf), swd_t=swd.astype(bf),
    )


# ---------------------------------------------------------------------------
# Wrapper: routing glue (tiny, gather/compare heavy -> plain JAX, f32) + one
# pallas_call.
# ---------------------------------------------------------------------------
def fused_moe_forward(hidden_states, kp):
    Bc, Sc, Hc = hidden_states.shape
    x = hidden_states.reshape(-1, Hc).astype(jnp.float32)           # (T, H)
    Tn = x.shape[0]

    logits = x @ kp["gate_w"].T                                      # (T, E)
    scores = jax.nn.softmax(logits, axis=-1)
    topk_w, topk_i = jax.lax.top_k(scores, K)                        # (T, K)
    inv_map = kp["inv_mapping"]                                      # (NG, G) int32
    eq = (topk_i[None, :, None, :] == inv_map[:, None, :, None])     # (NG,T,G,K)
    flat_w = jnp.sum(topk_w[None, :, None, :] * eq, axis=-1)         # (NG,T,G)
    scal = jnp.sum(flat_w, axis=-1, keepdims=True)                   # (NG,T,1)
    w_soft = jax.nn.softmax(jnp.where(flat_w == 0.0, -1e9, flat_w), axis=-1)
    act = (jnp.abs(w_soft) > 1e-6).astype(jnp.float32)
    # per-LoRA-column scale, slot-major / rank-minor, duplicated for gate|up halves
    wrep = jnp.repeat(w_soft * act, R, axis=-1)                      # (NG,T,GR)
    route = jnp.concatenate([wrep, wrep], axis=-1)                   # (NG,T,LW)

    x_bf = jnp.pad(x, ((0, 0), (0, HP - Hc))).astype(jnp.bfloat16)   # (T, HP)

    # Token tile: small here so TM=8 yields >=2 tiles and keeps v7x's second
    # TensorCore busy on the "parallel" axis.  At production sizes derive TM
    # from the HBM/MXU roofline (>=640 v6e, >=320 v7x, >=256 v5e) and stream
    # weights per group instead of keeping them fully VMEM-resident.
    TM = 8 if (Tn % 8 == 0 and Tn // 8 >= 2) else Tn
    grid = (Tn // TM, NG)

    y = pl.pallas_call(
        _fused_moe_kernel,
        out_shape=jax.ShapeDtypeStruct((Tn, HP), jnp.bfloat16),
        grid=grid,
        in_specs=[
            # per-token-tile activations / routing (streamed)
            pl.BlockSpec((TM, HP), lambda t, g: (t, 0)),             # x (bf16)
            pl.BlockSpec((1, TM, LW), lambda t, g: (g, t, 0)),       # wrep (f32)
            pl.BlockSpec((1, TM, 1), lambda t, g: (g, t, 0)),        # scal (f32)
            # weights: full-array blocks, constant index -> DMA'd once, resident
            pl.BlockSpec((NG, G, HP), lambda t, g: (0, 0, 0)),       # mask_up_proj
            pl.BlockSpec((NG, HP, 2 * IP), lambda t, g: (0, 0, 0)),  # gate|up base
            pl.BlockSpec((NG, IP, HP), lambda t, g: (0, 0, 0)),      # down base
            pl.BlockSpec((NG, HP, LW), lambda t, g: (0, 0, 0)),      # gate|up LoRA A
            pl.BlockSpec((NG, LW, 2 * IP), lambda t, g: (0, 0, 0)),  # gate|up LoRA B
            pl.BlockSpec((NG, IP, LW), lambda t, g: (0, 0, 0)),      # down LoRA A
            pl.BlockSpec((NG, LW, HP), lambda t, g: (0, 0, 0)),      # down LoRA B
            pl.BlockSpec((HP, 2 * ISP), lambda t, g: (0, 0)),        # shared gate|up
            pl.BlockSpec((ISP, HP), lambda t, g: (0, 0)),            # shared down
        ],
        out_specs=pl.BlockSpec((TM, HP), lambda t, g: (t, 0)),
        scratch_shapes=[pltpu.VMEM((TM, HP), jnp.float32)],          # f32 accumulator
        compiler_params=pltpu.CompilerParams(
            dimension_semantics=("parallel", "arbitrary"),
            vmem_limit_bytes=48 * 1024 * 1024),
    )(x_bf, route, scal,
      kp["wmask_t"], kp["wgu_t"], kp["wd_t"],
      kp["qagu_t"], kp["qbgu_t"], kp["qad_t"], kp["qbd_t"],
      kp["swgu_t"], kp["swd_t"])

    return y[:, :Hc].astype(hidden_states.dtype).reshape(Bc, Sc, Hc)


# ---------------------------------------------------------------------------
# Pure-JAX reference (mirrors the PyTorch forward semantics, f32)
# ---------------------------------------------------------------------------
def reference_forward(hidden_states, p):
    x = hidden_states.reshape(-1, H)
    logits = x @ p["gate_w"].T
    scores = jax.nn.softmax(logits, axis=-1)
    tw, ti = jax.lax.top_k(scores, K)
    y = jnp.zeros_like(x)
    for g in range(NG):
        idxs = p["inv_mapping"][g]
        flat = jnp.stack(
            [jnp.sum(tw * (ti == idxs[i]), axis=-1) for i in range(G)], axis=-1)
        scal = jnp.sum(flat, axis=-1, keepdims=True)
        ws = jax.nn.softmax(jnp.where(flat == 0.0, -1e9, flat), axis=-1)
        act = (jnp.abs(ws) > 1e-6).astype(jnp.float32)
        x2 = x + ws @ p["wmask"][g].T

        def flin(xin, wb, qa, qb, sf):
            out = xin @ wb.T
            ad = jnp.zeros_like(out)
            for i in range(G):
                ao = (xin @ qa[i].T) @ qb[i].T
                ao = ao * (ws[:, i:i + 1] * act[:, i:i + 1])
                ad = ad + 0.1 * ao * sf[i][None]
            return out + ad

        go = flin(x2, p["wg"][g], p["qag"][g], p["qbg"][g], p["sfg"][g])
        uo = flin(x2, p["wu"][g], p["qau"][g], p["qbu"][g], p["sfu"][g])
        hm = jax.nn.silu(go) * uo
        do = flin(hm, p["wd"][g], p["qad"][g], p["qbd"][g], p["sfd"][g])
        y = y + scal * do
    y = y.reshape(hidden_states.shape)
    gsh = x @ p["s_wg"].T
    ush = x @ p["s_wu"].T
    dsh = (jax.nn.silu(gsh) * ush) @ p["s_wd"].T
    return y + dsh.reshape(hidden_states.shape)


# ---------------------------------------------------------------------------
# Deterministic parameter init (PyTorch nn.Linear convention: W is (out, in))
# ---------------------------------------------------------------------------
def init_params(key):
    ks = jax.random.split(key, 16)

    def nrm(k, shape, std=0.02):
        return jax.random.normal(k, shape, dtype=jnp.float32) * std

    return dict(
        gate_w=nrm(ks[0], (E, H)),
        inv_mapping=jnp.arange(E, dtype=jnp.int32).reshape(NG, G),
        wmask=nrm(ks[1], (NG, H, G)),
        wg=nrm(ks[2], (NG, I, H)),
        wu=nrm(ks[3], (NG, I, H)),
        wd=nrm(ks[4], (NG, H, I)),
        qag=nrm(ks[5], (NG, G, R, H)),
        qbg=nrm(ks[6], (NG, G, I, R)),
        qau=nrm(ks[7], (NG, G, R, H)),
        qbu=nrm(ks[8], (NG, G, I, R)),
        qad=nrm(ks[9], (NG, G, R, I)),
        qbd=nrm(ks[10], (NG, G, H, R)),
        sfg=jnp.ones((NG, G, I), jnp.float32),
        sfu=jnp.ones((NG, G, I), jnp.float32),
        sfd=jnp.ones((NG, G, H), jnp.float32),
        s_wg=nrm(ks[11], (I_SHARED, H)),
        s_wu=nrm(ks[12], (I_SHARED, H)),
        s_wd=nrm(ks[13], (H, I_SHARED)),
    )


if __name__ == "__main__":
    key = jax.random.PRNGKey(0)
    k_x, k_p = jax.random.split(key)
    hidden_states = jax.random.normal(k_x, (B, S, H), dtype=jnp.float32)
    params = init_params(k_p)
    packed = pack_params(params)

    out = fused_moe_forward(hidden_states, packed)
    out = jax.block_until_ready(out)

    ref = jax.block_until_ready(reference_forward(hidden_states, params))
    np.testing.assert_allclose(np.asarray(out), np.asarray(ref),
                               rtol=5e-2, atol=5e-3)
    print("KERNEL_OK")
</pallas_src>

<mosaic_0001>
module attributes {stable_mosaic.version = 11 : i64} {
  func.func @_fused_moe_kernel(%arg0: i32, %arg1: i32, %arg2: memref<8x128xbf16, #tpu.memory_space<vmem>>, %arg3: memref<1x8x64xf32, #tpu.memory_space<vmem>>, %arg4: memref<1x8x1xf32, #tpu.memory_space<vmem>>, %arg5: memref<2x4x128xf32, #tpu.memory_space<vmem>>, %arg6: memref<2x128x256xbf16, #tpu.memory_space<vmem>>, %arg7: memref<2x128x128xbf16, #tpu.memory_space<vmem>>, %arg8: memref<2x128x64xbf16, #tpu.memory_space<vmem>>, %arg9: memref<2x64x256xbf16, #tpu.memory_space<vmem>>, %arg10: memref<2x128x64xbf16, #tpu.memory_space<vmem>>, %arg11: memref<2x64x128xbf16, #tpu.memory_space<vmem>>, %arg12: memref<128x256xbf16, #tpu.memory_space<vmem>>, %arg13: memref<128x128xbf16, #tpu.memory_space<vmem>>, %arg14: memref<8x128xbf16, #tpu.memory_space<vmem>>, %arg15: memref<8x128xf32, #tpu.memory_space<vmem>>) attributes {dimension_semantics = [#tpu.dimension_semantics<parallel>, #tpu.dimension_semantics<arbitrary>], iteration_bounds = array<i64: 2, 2>, scalar_prefetch = 0 : i64, scratch_operands = 1 : i64, tpu.core_type = #tpu.core_type<tc>, window_params = [{transform_indices = @transform_0, window_bounds = array<i64: 8, 128>}, {transform_indices = @transform_1, window_bounds = array<i64: 1, 8, 64>}, {transform_indices = @transform_2, window_bounds = array<i64: 1, 8, 1>}, {pipeline_mode = #tpu.pipeline_mode<synchronous>, transform_indices = @transform_3, window_bounds = array<i64: 2, 4, 128>}, {pipeline_mode = #tpu.pipeline_mode<synchronous>, transform_indices = @transform_4, window_bounds = array<i64: 2, 128, 256>}, {pipeline_mode = #tpu.pipeline_mode<synchronous>, transform_indices = @transform_5, window_bounds = array<i64: 2, 128, 128>}, {pipeline_mode = #tpu.pipeline_mode<synchronous>, transform_indices = @transform_6, window_bounds = array<i64: 2, 128, 64>}, {pipeline_mode = #tpu.pipeline_mode<synchronous>, transform_indices = @transform_7, window_bounds = array<i64: 2, 64, 256>}, {pipeline_mode = #tpu.pipeline_mode<synchronous>, transform_indices = @transform_8, window_bounds = array<i64: 2, 128, 64>}, {pipeline_mode = #tpu.pipeline_mode<synchronous>, transform_indices = @transform_9, window_bounds = array<i64: 2, 64, 128>}, {pipeline_mode = #tpu.pipeline_mode<synchronous>, transform_indices = @transform_10, window_bounds = array<i64: 128, 256>}, {pipeline_mode = #tpu.pipeline_mode<synchronous>, transform_indices = @transform_11, window_bounds = array<i64: 128, 128>}, {transform_indices = @transform_12, window_bounds = array<i64: 8, 128>}]} {
    %c0 = arith.constant 0 : index
    %c0_0 = arith.constant 0 : index
    %0 = vector.load %arg2[%c0, %c0_0] : memref<8x128xbf16, #tpu.memory_space<vmem>>, vector<8x128xbf16>
    %c0_1 = arith.constant 0 : index
    %c0_2 = arith.constant 0 : index
    %c0_3 = arith.constant 0 : index
    %1 = vector.load %arg3[%c0_1, %c0_2, %c0_3] : memref<1x8x64xf32, #tpu.memory_space<vmem>>, vector<1x8x64xf32>
    %2 = vector.shape_cast %1 : vector<1x8x64xf32> to vector<8x64xf32>
    %c0_4 = arith.constant 0 : index
    %c0_5 = arith.constant 0 : index
    %c0_6 = arith.constant 0 : index
    %3 = vector.load %arg4[%c0_4, %c0_5, %c0_6] : memref<1x8x1xf32, #tpu.memory_space<vmem>>, vector<1x8x1xf32>
    %4 = vector.shape_cast %3 : vector<1x8x1xf32> to vector<8x1xf32>
    %c0_i32 = arith.constant 0 : i32
    %5 = arith.cmpi eq, %arg1, %c0_i32 : i32
    %6 = arith.extui %5 : i1 to i32
    %c0_i32_7 = arith.constant 0 : i32
    %7 = arith.cmpi ne, %6, %c0_i32_7 : i32
    scf.if %7 {
      %c0_33 = arith.constant 0 : index
      %c0_34 = arith.constant 0 : index
      %85 = vector.load %arg12[%c0_33, %c0_34] : memref<128x256xbf16, #tpu.memory_space<vmem>>, vector<128x256xbf16>
      %cst_35 = arith.constant dense<0.000000e+00> : vector<8x256xf32>
      %86 = tpu.matmul %0, %85, %cst_35 {dimension_numbers = #tpu.dot_dimension_numbers<[1], [0], [0], [1], [0, 0, 1, 1], [], []>} : vector<8x128xbf16>, vector<128x256xbf16>, vector<8x256xf32> -> vector<8x256xf32>
      %87 = vector.extract_strided_slice %86 {offsets = [0, 0], sizes = [8, 128], strides = [1, 1]} : vector<8x256xf32> to vector<8x128xf32>
      %88 = vector.extract_strided_slice %86 {offsets = [0, 128], sizes = [8, 128], strides = [1, 1]} : vector<8x256xf32> to vector<8x128xf32>
      %89 = arith.negf %87 : vector<8x128xf32>
      %90 = math.exp %89 : vector<8x128xf32>
      %cst_36 = arith.constant 1.000000e+00 : f32
      %91 = vector.broadcast %cst_36 : f32 to vector<8x128xf32>
      %92 = arith.addf %91, %90 : vector<8x128xf32>
      %93 = arith.divf %91, %92 : vector<8x128xf32>
      %94 = arith.mulf %87, %93 : vector<8x128xf32>
      %95 = arith.mulf %94, %88 : vector<8x128xf32>
      %96 = arith.truncf %95 : vector<8x128xf32> to vector<8x128xbf16>
      %c0_37 = arith.constant 0 : index
      %c0_38 = arith.constant 0 : index
      %97 = vector.load %arg13[%c0_37, %c0_38] : memref<128x128xbf16, #tpu.memory_space<vmem>>, vector<128x128xbf16>
      %cst_39 = arith.constant dense<0.000000e+00> : vector<8x128xf32>
      %98 = tpu.matmul %96, %97, %cst_39 {dimension_numbers = #tpu.dot_dimension_numbers<[1], [0], [0], [1], [0, 0, 1, 1], [], []>} : vector<8x128xbf16>, vector<128x128xbf16>, vector<8x128xf32> -> vector<8x128xf32>
      %c0_40 = arith.constant 0 : index
      %c0_41 = arith.constant 0 : index
      %99 = vector.load %arg15[%c0_40, %c0_41] : memref<8x128xf32, #tpu.memory_space<vmem>>, vector<8x128xf32>
      tpu.vector_store %arg15[%c0_40, %c0_41], %98 {strides = array<i32>} : memref<8x128xf32, #tpu.memory_space<vmem>>, vector<8x128xf32>,
    } else {
    }
    %8 = arith.index_cast %arg1 : i32 to index
    %c0_8 = arith.constant 0 : index
    %c0_9 = arith.constant 0 : index
    %9 = vector.load %arg5[%8, %c0_8, %c0_9] : memref<2x4x128xf32, #tpu.memory_space<vmem>>, vector<1x4x128xf32>
    %10 = vector.shape_cast %9 : vector<1x4x128xf32> to vector<4x128xf32>
    %11 = arith.extf %0 : vector<8x128xbf16> to vector<8x128xf32>
    %12 = vector.extract_strided_slice %2 {offsets = [0, 0], sizes = [8, 1], strides = [1, 1]} : vector<8x64xf32> to vector<8x1xf32>
    %13 = vector.extract_strided_slice %10 {offsets = [0, 0], sizes = [1, 128], strides = [1, 1]} : vector<4x128xf32> to vector<1x128xf32>
    %14 = vector.broadcast %12 : vector<8x1xf32> to vector<8x128xf32>
    %15 = vector.broadcast %13 : vector<1x128xf32> to vector<8x128xf32>
    %16 = arith.mulf %14, %15 : vector<8x128xf32>
    %17 = arith.addf %11, %16 : vector<8x128xf32>
    %18 = vector.extract_strided_slice %2 {offsets = [0, 8], sizes = [8, 1], strides = [1, 1]} : vector<8x64xf32> to vector<8x1xf32>
    %19 = vector.extract_strided_slice %10 {offsets = [1, 0], sizes = [1, 128], strides = [1, 1]} : vector<4x128xf32> to vector<1x128xf32>
    %20 = vector.broadcast %18 : vector<8x1xf32> to vector<8x128xf32>
    %21 = vector.broadcast %19 : vector<1x128xf32> to vector<8x128xf32>
    %22 = arith.mulf %20, %21 : vector<8x128xf32>
    %23 = arith.addf %17, %22 : vector<8x128xf32>
    %24 = vector.extract_strided_slice %2 {offsets = [0, 16], sizes = [8, 1], strides = [1, 1]} : vector<8x64xf32> to vector<8x1xf32>
    %25 = vector.extract_strided_slice %10 {offsets = [2, 0], sizes = [1, 128], strides = [1, 1]} : vector<4x128xf32> to vector<1x128xf32>
    %26 = vector.broadcast %24 : vector<8x1xf32> to vector<8x128xf32>
    %27 = vector.broadcast %25 : vector<1x128xf32> to vector<8x128xf32>
    %28 = arith.mulf %26, %27 : vector<8x128xf32>
    %29 = arith.addf %23, %28 : vector<8x128xf32>
    %30 = vector.extract_strided_slice %2 {offsets = [0, 24], sizes = [8, 1], strides = [1, 1]} : vector<8x64xf32> to vector<8x1xf32>
    %31 = vector.extract_strided_slice %10 {offsets = [3, 0], sizes = [1, 128], strides = [1, 1]} : vector<4x128xf32> to vector<1x128xf32>
    %32 = vector.broadcast %30 : vector<8x1xf32> to vector<8x128xf32>
    %33 = vector.broadcast %31 : vector<1x128xf32> to vector<8x128xf32>
    %34 = arith.mulf %32, %33 : vector<8x128xf32>
    %35 = arith.addf %29, %34 : vector<8x128xf32>
    %36 = arith.truncf %35 : vector<8x128xf32> to vector<8x128xbf16>
    %37 = arith.index_cast %arg1 : i32 to index
    %c0_10 = arith.constant 0 : index
    %c0_11 = arith.constant 0 : index
    %38 = vector.load %arg6[%37, %c0_10, %c0_11] : memref<2x128x256xbf16, #tpu.memory_space<vmem>>, vector<1x128x256xbf16>
    %39 = vector.shape_cast %38 : vector<1x128x256xbf16> to vector<128x256xbf16>
    %cst = arith.constant dense<0.000000e+00> : vector<8x256xf32>
    %40 = tpu.matmul %36, %39, %cst {dimension_numbers = #tpu.dot_dimension_numbers<[1], [0], [0], [1], [0, 0, 1, 1], [], []>} : vector<8x128xbf16>, vector<128x256xbf16>, vector<8x256xf32> -> vector<8x256xf32>
    %41 = arith.index_cast %arg1 : i32 to index
    %c0_12 = arith.constant 0 : index
    %c0_13 = arith.constant 0 : index
    %42 = vector.load %arg8[%41, %c0_12, %c0_13] : memref<2x128x64xbf16, #tpu.memory_space<vmem>>, vector<1x128x64xbf16>
    %43 = vector.shape_cast %42 : vector<1x128x64xbf16> to vector<128x64xbf16>
    %cst_14 = arith.constant dense<0.000000e+00> : vector<8x64xf32>
    %44 = tpu.matmul %36, %43, %cst_14 {dimension_numbers = #tpu.dot_dimension_numbers<[1], [0], [0], [1], [0, 0, 1, 1], [], []>} : vector<8x128xbf16>, vector<128x64xbf16>, vector<8x64xf32> -> vector<8x64xf32>
    %45 = arith.mulf %44, %2 : vector<8x64xf32>
    %46 = arith.truncf %45 : vector<8x64xf32> to vector<8x64xbf16>
    %47 = arith.index_cast %arg1 : i32 to index
    %c0_15 = arith.constant 0 : index
    %c0_16 = arith.constant 0 : index
    %48 = vector.load %arg9[%47, %c0_15, %c0_16] : memref<2x64x256xbf16, #tpu.memory_space<vmem>>, vector<1x64x256xbf16>
    %49 = vector.shape_cast %48 : vector<1x64x256xbf16> to vector<64x256xbf16>
    %cst_17 = arith.constant dense<0.000000e+00> : vector<8x256xf32>
    %50 = tpu.matmul %46, %49, %cst_17 {dimension_numbers = #tpu.dot_dimension_numbers<[1], [0], [0], [1], [0, 0, 1, 1], [], []>} : vector<8x64xbf16>, vector<64x256xbf16>, vector<8x256xf32> -> vector<8x256xf32>
    %51 = arith.addf %40, %50 : vector<8x256xf32>
    %52 = vector.extract_strided_slice %51 {offsets = [0, 0], sizes = [8, 128], strides = [1, 1]} : vector<8x256xf32> to vector<8x128xf32>
    %53 = vector.extract_strided_slice %51 {offsets = [0, 128], sizes = [8, 128], strides = [1, 1]} : vector<8x256xf32> to vector<8x128xf32>
    %54 = arith.negf %52 : vector<8x128xf32>
    %55 = math.exp %54 : vector<8x128xf32>
    %cst_18 = arith.constant 1.000000e+00 : f32
    %56 = vector.broadcast %cst_18 : f32 to vector<8x128xf32>
    %57 = arith.addf %56, %55 : vector<8x128xf32>
    %58 = arith.divf %56, %57 : vector<8x128xf32>
    %59 = arith.mulf %52, %58 : vector<8x128xf32>
    %60 = arith.mulf %59, %53 : vector<8x128xf32>
    %61 = arith.truncf %60 : vector<8x128xf32> to vector<8x128xbf16>
    %62 = arith.index_cast %arg1 : i32 to index
    %c0_19 = arith.constant 0 : index
    %c0_20 = arith.constant 0 : index
    %63 = vector.load %arg7[%62, %c0_19, %c0_20] : memref<2x128x128xbf16, #tpu.memory_space<vmem>>, vector<1x128x128xbf16>
    %64 = vector.shape_cast %63 : vector<1x128x128xbf16> to vector<128x128xbf16>
    %cst_21 = arith.constant dense<0.000000e+00> : vector<8x128xf32>
    %65 = tpu.matmul %61, %64, %cst_21 {dimension_numbers = #tpu.dot_dimension_numbers<[1], [0], [0], [1], [0, 0, 1, 1], [], []>} : vector<8x128xbf16>, vector<128x128xbf16>, vector<8x128xf32> -> vector<8x128xf32>
    %66 = arith.index_cast %arg1 : i32 to index
    %c0_22 = arith.constant 0 : index
    %c0_23 = arith.constant 0 : index
    %67 = vector.load %arg10[%66, %c0_22, %c0_23] : memref<2x128x64xbf16, #tpu.memory_space<vmem>>, vector<1x128x64xbf16>
    %68 = vector.shape_cast %67 : vector<1x128x64xbf16> to vector<128x64xbf16>
    %cst_24 = arith.constant dense<0.000000e+00> : vector<8x64xf32>
    %69 = tpu.matmul %61, %68, %cst_24 {dimension_numbers = #tpu.dot_dimension_numbers<[1], [0], [0], [1], [0, 0, 1, 1], [], []>} : vector<8x128xbf16>, vector<128x64xbf16>, vector<8x64xf32> -> vector<8x64xf32>
    %70 = arith.mulf %69, %2 : vector<8x64xf32>
    %71 = arith.truncf %70 : vector<8x64xf32> to vector<8x64xbf16>
    %72 = arith.index_cast %arg1 : i32 to index
    %c0_25 = arith.constant 0 : index
    %c0_26 = arith.constant 0 : index
    %73 = vector.load %arg11[%72, %c0_25, %c0_26] : memref<2x64x128xbf16, #tpu.memory_space<vmem>>, vector<1x64x128xbf16>
    %74 = vector.shape_cast %73 : vector<1x64x128xbf16> to vector<64x128xbf16>
    %cst_27 = arith.constant dense<0.000000e+00> : vector<8x128xf32>
    %75 = tpu.matmul %71, %74, %cst_27 {dimension_numbers = #tpu.dot_dimension_numbers<[1], [0], [0], [1], [0, 0, 1, 1], [], []>} : vector<8x64xbf16>, vector<64x128xbf16>, vector<8x128xf32> -> vector<8x128xf32>
    %76 = arith.addf %65, %75 : vector<8x128xf32>
    %c0_28 = arith.constant 0 : index
    %c0_29 = arith.constant 0 : index
    %77 = vector.load %arg15[%c0_28, %c0_29] : memref<8x128xf32, #tpu.memory_space<vmem>>, vector<8x128xf32>
    %78 = vector.broadcast %4 : vector<8x1xf32> to vector<8x128xf32>
    %79 = arith.mulf %78, %76 : vector<8x128xf32>
    %80 = arith.addf %77, %79 : vector<8x128xf32>
    %c0_30 = arith.constant 0 : index
    %c0_31 = arith.constant 0 : index
    %81 = vector.load %arg15[%c0_30, %c0_31] : memref<8x128xf32, #tpu.memory_space<vmem>>, vector<8x128xf32>
    tpu.vector_store %arg15[%c0_30, %c0_31], %80 {strides = array<i32>} : memref<8x128xf32, #tpu.memory_space<vmem>>, vector<8x128xf32>,
    %c1_i32 = arith.constant 1 : i32
    %82 = arith.cmpi eq, %arg1, %c1_i32 : i32
    %83 = arith.extui %82 : i1 to i32
    %c0_i32_32 = arith.constant 0 : i32
    %84 = arith.cmpi ne, %83, %c0_i32_32 : i32
    scf.if %84 {
      %c0_33 = arith.constant 0 : index
      %c0_34 = arith.constant 0 : index
      %85 = vector.load %arg15[%c0_33, %c0_34] : memref<8x128xf32, #tpu.memory_space<vmem>>, vector<8x128xf32>
      %86 = arith.truncf %85 : vector<8x128xf32> to vector<8x128xbf16>
      %c0_35 = arith.constant 0 : index
      %c0_36 = arith.constant 0 : index
      %87 = vector.load %arg14[%c0_35, %c0_36] : memref<8x128xbf16, #tpu.memory_space<vmem>>, vector<8x128xbf16>
      tpu.vector_store %arg14[%c0_35, %c0_36], %86 {strides = array<i32>} : memref<8x128xbf16, #tpu.memory_space<vmem>>, vector<8x128xbf16>,
    } else {
    }
    return
  }
  func.func @transform_0(%arg0: i32, %arg1: i32) -> (i32, i32) {
    %c0_i32 = arith.constant 0 : i32
    %c0_i32_0 = arith.constant 0 : i32
    return %arg0, %c0_i32 : i32, i32
  }
  func.func @transform_1(%arg0: i32, %arg1: i32) -> (i32, i32, i32) {
    %c0_i32 = arith.constant 0 : i32
    %c0_i32_0 = arith.constant 0 : i32
    return %arg1, %arg0, %c0_i32 : i32, i32, i32
  }
  func.func @transform_2(%arg0: i32, %arg1: i32) -> (i32, i32, i32) {
    %c0_i32 = arith.constant 0 : i32
    %c0_i32_0 = arith.constant 0 : i32
    return %arg1, %arg0, %c0_i32 : i32, i32, i32
  }
  func.func @transform_3(%arg0: i32, %arg1: i32) -> (i32, i32, i32) {
    %c0_i32 = arith.constant 0 : i32
    %c0_i32_0 = arith.constant 0 : i32
    %c0_i32_1 = arith.constant 0 : i32
    %c0_i32_2 = arith.constant 0 : i32
    return %c0_i32, %c0_i32_0, %c0_i32_1 : i32, i32, i32
  }
  func.func @transform_4(%arg0: i32, %arg1: i32) -> (i32, i32, i32) {
    %c0_i32 = arith.constant 0 : i32
    %c0_i32_0 = arith.constant 0 : i32
    %c0_i32_1 = arith.constant 0 : i32
    %c0_i32_2 = arith.constant 0 : i32
    return %c0_i32, %c0_i32_0, %c0_i32_1 : i32, i32, i32
  }
  func.func @transform_5(%arg0: i32, %arg1: i32) -> (i32, i32, i32) {
    %c0_i32 = arith.constant 0 : i32
    %c0_i32_0 = arith.constant 0 : i32
    %c0_i32_1 = arith.constant 0 : i32
    %c0_i32_2 = arith.constant 0 : i32
    return %c0_i32, %c0_i32_0, %c0_i32_1 : i32, i32, i32
  }
  func.func @transform_6(%arg0: i32, %arg1: i32) -> (i32, i32, i32) {
    %c0_i32 = arith.constant 0 : i32
    %c0_i32_0 = arith.constant 0 : i32
    %c0_i32_1 = arith.constant 0 : i32
    %c0_i32_2 = arith.constant 0 : i32
    return %c0_i32, %c0_i32_0, %c0_i32_1 : i32, i32, i32
  }
  func.func @transform_7(%arg0: i32, %arg1: i32) -> (i32, i32, i32) {
    %c0_i32 = arith.constant 0 : i32
    %c0_i32_0 = arith.constant 0 : i32
    %c0_i32_1 = arith.constant 0 : i32
    %c0_i32_2 = arith.constant 0 : i32
    return %c0_i32, %c0_i32_0, %c0_i32_1 : i32, i32, i32
  }
  func.func @transform_8(%arg0: i32, %arg1: i32) -> (i32, i32, i32) {
    %c0_i32 = arith.constant 0 : i32
    %c0_i32_0 = arith.constant 0 : i32
    %c0_i32_1 = arith.constant 0 : i32
    %c0_i32_2 = arith.constant 0 : i32
    return %c0_i32, %c0_i32_0, %c0_i32_1 : i32, i32, i32
  }
  func.func @transform_9(%arg0: i32, %arg1: i32) -> (i32, i32, i32) {
    %c0_i32 = arith.constant 0 : i32
    %c0_i32_0 = arith.constant 0 : i32
    %c0_i32_1 = arith.constant 0 : i32
    %c0_i32_2 = arith.constant 0 : i32
    return %c0_i32, %c0_i32_0, %c0_i32_1 : i32, i32, i32
  }
  func.func @transform_10(%arg0: i32, %arg1: i32) -> (i32, i32) {
    %c0_i32 = arith.constant 0 : i32
    %c0_i32_0 = arith.constant 0 : i32
    %c0_i32_1 = arith.constant 0 : i32
    return %c0_i32, %c0_i32_0 : i32, i32
  }
  func.func @transform_11(%arg0: i32, %arg1: i32) -> (i32, i32) {
    %c0_i32 = arith.constant 0 : i32
    %c0_i32_0 = arith.constant 0 : i32
    %c0_i32_1 = arith.constant 0 : i32
    return %c0_i32, %c0_i32_0 : i32, i32
  }
  func.func @transform_12(%arg0: i32, %arg1: i32) -> (i32, i32) {
    %c0_i32 = arith.constant 0 : i32
    %c0_i32_0 = arith.constant 0 : i32
    return %arg0, %c0_i32 : i32, i32
  }
}

</mosaic_0001>

<bundles_post_ra>
// kernel: tpu_custom_call.1
= control target key start
LH: loop header
LB: loop body
LE: loop exit
PB: predicated region body
PF: predicated region fallthrough
CT: control target
= control target key end

     0   :  { %s2878_s0 = inlined_call_operand.hbm [shape: bf16[16,128], index: 0, kind: input, shape index: {}]   ;;  %s2879_s1 = inlined_call_operand.vmem [shape: f32[2,16,64], index: 1, kind: input, shape index: {}]   ;;  %s2880_s2 = inlined_call_operand.vmem [shape: f32[2,16,1], index: 2, kind: input, shape index: {}]   ;;  %s2881_s3 = inlined_call_operand.hbm [shape: f32[2,4,128], index: 3, kind: input, shape index: {}]   ;;  %s2882_s4 = inlined_call_operand.vmem [shape: bf16[2,128,256], index: 4, kind: input, shape index: {}]   ;;  %s2883_s5 = inlined_call_operand.hbm [shape: bf16[2,128,128], index: 5, kind: input, shape index: {}]   ;;  %s2884_s6 = inlined_call_operand.vmem [shape: bf16[2,128,64], index: 6, kind: input, shape index: {}]   ;;  %s2885_s7 = inlined_call_operand.hbm [shape: bf16[2,64,256], index: 7, kind: input, shape index: {}]   ;;  %s2886_s8 = inlined_call_operand.vmem [shape: bf16[2,128,64], index: 8, kind: input, shape index: {}]   ;;  %s2887_s9 = inlined_call_operand.vmem [shape: bf16[2,64,128], index: 9, kind: input, shape index: {}]   ;;  %s2888_s10 = inlined_call_operand.hbm [shape: bf16[128,256], index: 10, kind: input, shape index: {}]   ;;  %s2889_s11 = inlined_call_operand.hbm [shape: bf16[128,128], index: 11, kind: input, shape index: {}]   ;;  %s2890_s12 = inlined_call_operand.hbm [shape: bf16[16,128], index: 12, kind: output, shape index: {}]  }
   0x1   :  { %2893 = sst [smem:[#allocation21_spill]] %s2881_s3 }
   0x2   :  { %2894 = sst [smem:[#allocation22_spill]] %s2882_s4 }
   0x3   :  { %2895 = sst [smem:[#allocation23_spill]] %s2883_s5 }
   0x4   :  { %2896 = sst [smem:[#allocation24_spill]] %s2884_s6 }
   0x5   :  { %2897 = sst [smem:[#allocation25_spill]] %s2885_s7 }
   0x6   :  { %2898 = sst [smem:[#allocation26_spill]] %s2886_s8 }
   0x7   :  { %2899 = sst [smem:[#allocation27_spill]] %s2887_s9 }
   0x8   :  { %2900 = sst [smem:[#allocation28_spill]] %s2888_s10 }
   0x9   :  { %2901 = sst [smem:[#allocation29_spill]] %s2889_s11 }
   0xa   :  { %2902 = sst [smem:[#allocation30_spill]] %s2890_s12 }
   0xb   :  { %17 = vsyncpa [#allocation4], 0 }
   0xc   :  { %19 = vsyncpa [#allocation4 + $0x1], 0 }
   0xd   :  { %20 = vsyncpa [#allocation7], 0 }
   0xe   :  { %21 = vsyncpa [#allocation10], 0 }
   0xf   :  { %22 = vsyncpa [#allocation13], 0 }
  0x10   :  { %23 = vsyncpa [#allocation5], 0 }
  0x11   :  { %25 = vsyncpa [#allocation5 + $0x1], 0  ;;  %s2534_s21 = smov 0   ;;  %s2536_s22 = smov 0  }
  0x12   :  { %s2538_s23 = smov 0   ;;  %s2540_s24 = smov 0  }
  0x13   :  { %s2542_s25 = smov 0   ;;  %s2544_s26 = smov 0  }
  0x14   :  { %s2546_s27 = smov 0   ;;  %s2548_s28 = smov 0  }
  0x15 LB: > { %s2891_s29 = sadd.s32 4294967295, %s2454_s28   ;;  %p1585_p0 = scmp.ge.s32.totalorder %s2454_s28, 1  ;;  %s2454_s28 = sphi %s2548_s28, %s31_s28   ;;  %s2450_s27 = sphi %s2546_s27, %s2929_s27   ;;  %s2446_s26 = sphi %s2544_s26, %s2928_s26   ;;  %s2442_s25 = sphi %s2542_s25, %s2927_s25   ;;  %s2438_s24 = sphi %s2540_s24, %s2926_s24   ;;  %s2434_s23 = sphi %s2538_s23, %s2925_s23   ;;  %s2430_s22 = sphi %s2536_s22, %s2924_s22   ;;  %s2426_s21 = sphi %s2534_s21, %s2923_s21  }
  0x16   : > { %p2578_p1 = scmp.eq.s32.totalorder %s2891_s29, 0  ;;  %p345_p2 = scmp.lt.s32.totalorder %s2454_s28, 5 }
  0x17   : > { %s2904_s3 = sld [smem:[#allocation21_spill]]  ;;  %s2456_s17 = smov [#allocation6]  }
  0x18   : > { %p2586_p3 = pnand %p1585_p0, %p345_p2  ;;  %s358_s18 = sshll.u32 %s2456_s17, 4  ;;  %s359_s18 = int_to_ptr.vmem [resolvable:$true] %s358_s18 }
  0x19   : > { %s2907_s7 = sld [smem:[#allocation25_spill]]  ;;  %s2457_s14 = smov 64  }
  0x1a   : > { %p2037_p4 = pneg %p2586_p3  ;;  %s2459_s12 = smov [#allocation9]  }
  0x1b   : > { %s392_s17 = sshll.u32 %s2459_s12, 4  ;;  %s2460_s9 = smov 128   ;;  %s393_s17 = int_to_ptr.vmem [resolvable:$true] %s392_s17 }
  0x1c   : > { %p2594_p5 = pnand %p2037_p4, %p2578_p1  ;;  %s2461_s8 = smov 8  }
  0x1d   : > { %s356_s15 = sshll.u32 %s2904_s3, 4  ;;  %s2458_s3 = smov 4   ;;  %s357_s15 = int_to_ptr.hbm [resolvable:$true] %s356_s15 }
  0x1e   : > { %2040 = dma.hbm_to_vmem [thread:$0]  (!%p2594_p5), %s357_s15, 128, %s359_s18, [#allocation7], %s2457_s14, %s2457_s14, %s2458_s3  }
  0x1f   : > { %s390_s13 = sshll.u32 %s2907_s7, 4  ;;  %s2908_s5 = sld [smem:[#allocation23_spill]]  ;;  %s391_s13 = int_to_ptr.hbm [resolvable:$true] %s390_s13 }
  0x20   : > { %2046 = dma.hbm_to_vmem [thread:$0]  (!%p2594_p5), %s391_s13, 2048, %s393_s17, [#allocation10], %s2460_s9, %s2460_s9, %s2461_s8  }
  0x21   : > { %s2462_s20 = smov [#allocation8]   ;;  %s2909_s10 = sld [smem:[#allocation28_spill]] }
  0x22   : > { %s375_s7 = sshll.u32 %s2462_s20, 4  ;;  %s2463_s4 = smov [#allocation11]   ;;  %s376_s7 = int_to_ptr.vmem [resolvable:$true] %s375_s7 }
  0x23   : > { %s412_s6 = sshll.u32 %s2463_s4, 4  ;;  %s2910_s11 = sld [smem:[#allocation29_spill]]  ;;  %s413_s6 = int_to_ptr.vmem [resolvable:$true] %s412_s6 }
  0x24   : > { %s2464_s15 = smov [#allocation12]   ;;  %s40_s18 = sadd.s32 1, %s2446_s26 }
  0x25   : > { %s373_s29 = sshll.u32 %s2908_s5, 4  ;;  %s43_s4 = sadd.s32 1, %s2450_s27  ;;  %s374_s29 = int_to_ptr.hbm [resolvable:$true] %s373_s29 }
  0x26   : > { %2043 = dma.hbm_to_vmem [thread:$0]  (!%p2594_p5), %s374_s29, 2048, %s376_s7, [#allocation7], %s2457_s14, %s2457_s14, %s2458_s3  }
  0x27   : > { %s410_s12 = sshll.u32 %s2909_s10, 4  ;;  %s426_s7 = sshll.u32 %s2464_s15, 4  ;;  %s411_s12 = int_to_ptr.hbm [resolvable:$true] %s410_s12  ;;  %s427_s7 = int_to_ptr.vmem [resolvable:$true] %s426_s7 }
  0x28   : > { %2049 = dma.hbm_to_vmem [thread:$0]  (!%p2594_p5), %s411_s12, 2048, %s413_s6, [#allocation10], %s2460_s9, %s2460_s9, %s2461_s8  }
  0x29   : > { %s424_s20 = sshll.u32 %s2910_s11, 4  ;;  %s1584_s29 = sadd.s32 4294967294, %s2454_s28   ;;  %s425_s20 = int_to_ptr.hbm [resolvable:$true] %s424_s20 }
  0x2a   : > { %2052 = dma.hbm_to_vmem [thread:$0]  (!%p2594_p5), %s425_s20, 1024, %s427_s7, [#allocation13], %s2457_s14, %s2457_s14, %s2458_s3  }
  0x2b   : > { %p41_p6 = scmp.ge.s32.totalorder %s40_s18, 2  ;;  %s50_s13 = sadd.s32 1, %s2434_s23 }
  0x2c   : > { %p57_p7 = scmp.ne.s32.totalorder %s2434_s23, %s2430_s22  ;;  %p58_p8 = scmp.eq.s32.totalorder %s2454_s28, 0 }
  0x2d   : > { %s2931_s18 = smov (%p41_p6, %s40_s18), 0  ;;  %s2933_s4 = smov (!%p41_p6, %s43_s4), %s2450_s27 }
  0x2e   : > { %2911 = sst [smem:[#allocation20_spill]] %s2931_s18  ;;  %p2630_p9 = por %p58_p8, %p57_p7 }
  0x2f   : > { %p63_p10 = scmp.ne.s32.totalorder %s2430_s22, %s2426_s21  ;;  %p45_p11 = scmp.ge.s32.totalorder %s2933_s4, 2 }
  0x30   : > { %s2913_s3 = sadd.s32 4294967295, %s2454_s28   ;;  %p338_p0 = scmp.eq.s32.totalorder %s1584_s29, 3 }
  0x31   : > { %p332_p12 = scmp.eq.s32.totalorder %s2913_s3, 3  ;;  %p2640_p13 = por %p2578_p1, %p63_p10 }
  0x32   : > { %s2935_s4 = smov (%p45_p11, %s2933_s4), 0  ;;  %p2650_p4 = por %p338_p0, %p63_p10 }
  0x33   : > { %p2646_p2 = por %p332_p12, %p57_p7  ;;  %s47_s12 = ssub.s32 %s2450_s27, %s2935_s4 }
  0x34   : > { %p2066_p5 = scmp.lt.s32.totalorder %s2454_s28, 4  ;;  %p48_p6 = scmp.eq.s32.totalorder %s47_s12, 0 }
  0x35   : > { %s440_s6 = sand.u32 1, %s2434_s23   ;;  %s1593_s15 = sshll.u32 %s2450_s27, 2 }
  0x36   : > { %s1592_s17 = sshll.u32 %s440_s6, 2  ;;  %s448_s3 = scalar_lea.hbm %s2878_s0, %s1593_s15 }
  0x37   : > { %s2659_s20 = scalar_select %p48_p6, %s2434_s23, %s50_s13  }
  0x38   : > { %s444_s5 = scalar_lea.vmem [#allocation3], %s1592_s17  ;;  %s450_s11 = sshll.u32 %s448_s3, 4  ;;  %s451_s11 = int_to_ptr.hbm [resolvable:$true] %s450_s11 }
  0x39   : > { %s452_s10 = sshll.u32 %s444_s5, 4  ;;  %p2054_p7 = pnand %p2066_p5, %p2630_p9  ;;  %s453_s10 = int_to_ptr.vmem [resolvable:$true] %s452_s10 }
  0x3a   : > { %s441_s18 = scalar_lea.sflag [#allocation4], %s440_s6  ;;  %483 = sbr.rel (%p2586_p3) target bundleno = 1141 (0x475), region = 68 }
  0x3b   : > { %2056 = dma.hbm_to_vmem [thread:$0]  (!%p2054_p7), %s451_s11, 64, %s453_s10, %s441_s18  }
  0x3c   : > { %s2670_s13 = sand.u32 (!%p2586_p3), 1, %s2430_s22  }
  0x3d   : > { %s1595_s12 = sshll.u32 (!%p2586_p3), %s2670_s13, 2  ;;  %s486_s15 = scalar_lea.sflag (!%p2586_p3), [#allocation4], %s2670_s13 }
  0x3e   : > { %s489_s17 = scalar_lea.vmem (!%p2586_p3), [#allocation3], %s1595_s12 }
  0x3f   : > { %2405 = dma.done.wait (%p2640_p13), %s486_s15, 64  }
  0x40   : > { %2407 = vsyncadd (%p2640_p13), %s486_s15, 4294967232 }
  0x41   : > { %2409 = dma.done.wait (%p2578_p1), [#allocation7], 2176  }
  0x42   : > { %2411 = vsyncadd (%p2578_p1), [#allocation7], 4294965120 }
  0x43   : > { %2413 = dma.done.wait (%p2578_p1), [#allocation10], 4096  }
  0x44   : > { %2415 = vsyncadd (%p2578_p1), [#allocation10], 4294963200 }
  0x45   : > { %2417 = dma.done.wait (%p2578_p1), [#allocation13], 1024  }
  0x46   : > { %2419 = vsyncadd (%p2578_p1), [#allocation13], 4294966272  ;;  %p572_p3 = scmp.lt.s32.totalorder %s2438_s24, 1  ;;  %p574_p8 = scmp.lt.s32.totalorder %s2442_s25, 1  ;;  %v2700_v0 = vld [vmem:[%s489_s17] sm:$0xf] }
  0x47   : > { %s2706_s3 = scalar_lea.vmem [#allocation14], %s1595_s12  ;;  %p1606_p1 = scmp.ne.s32.totalorder %s2438_s24, 0 }
  0x48   : > { %s573_s5 = scalar_select %p572_p3, %s2438_s24, 1 }
  0x49   : > { %s575_s10 = scalar_select %p574_p8, %s2442_s25, 1 }
  0x4a   : > { %s1602_s11 = sshll.u32 %s573_s5, 1 }
  0x4b   : > { %s577_s16 = sadd.s32 %s1602_s11, %s575_s10  ;;  %595 = sbr.rel (%p1606_p1) target bundleno = 414 (0x19e), region = 96 }
  0x4c   : > { %s1603_s18 = sshll.u32 %s577_s16, 3 }
  0x4d   : > { %s579_s6 = scalar_lea.vmem %s2879_s1, %s1603_s18  ;;  %s587_s30 = scalar_lea.vmem %s2880_s2, %s1603_s18 }
  0x4e   : > { %v2702_v1 = vld [vmem:[%s579_s6] sm:$0xff] }
  0x4f   : > { %v2704_v2 = vld [vmem:[%s587_s30] sm:$0xff] }
  0x50   : > { %v1665_v3 = vld [vmem:[#allocation11 + $0x70] sm:$0xf]  ;;  %v1946_v4 = vld [vmem:[#allocation11 + $0x74] sm:$0xf0]  ;;  %v1657_v5 = vld [vmem:[#allocation11 + $0x60] sm:$0xf] }
  0x51   : > { %v1666_v6 = vor.u32 %v1946_v4, %v1665_v3  ;;  %v1944_v7 = vld [vmem:[#allocation11 + $0x64] sm:$0xf0]  ;;  %v1649_v9 = vld [vmem:[#allocation11 + $0x50] sm:$0xf]  ;;  %v1942_v10 = vld [vmem:[#allocation11 + $0x54] sm:$0xf0] }
  0x52   : > { %v1658_v8 = vor.u32 %v1944_v7, %v1657_v5  ;;  %v1945_v11 = vld [vmem:[#allocation11 + $0x74] sm:$0xf]  ;;  %v1667_v12 = vld [vmem:[#allocation11 + $0x78] sm:$0xf0]  ;;  %v1943_v14 = vld [vmem:[#allocation11 + $0x64] sm:$0xf]  ;;  %v1650_v16 = vor.u32 %v1942_v10, %v1649_v9 }
  0x53   : > { %692 = vmatpush.bf16.msra.mxu0 %v1666_v6  ;;  %v1670_v13 = vor.u32 %v1945_v11, %v1667_v12  ;;  %v1659_v15 = vld [vmem:[#allocation11 + $0x68] sm:$0xf0]  ;;  %v1641_v17 = vld [vmem:[#allocation11 + $0x40] sm:$0xf]  ;;  %v1940_v19 = vld [vmem:[#allocation11 + $0x44] sm:$0xf0] }
  0x54   : > { %v1662_v18 = vor.u32 %v1943_v14, %v1659_v15  ;;  %v1941_v20 = vld [vmem:[#allocation11 + $0x54] sm:$0xf]  ;;  %v1651_v21 = vld [vmem:[#allocation11 + $0x58] sm:$0xf0]  ;;  %v1642_v22 = vor.u32 %v1940_v19, %v1641_v17  ;;  %v1633_v23 = vld [vmem:[#allocation11 + $0x30] sm:$0xf] }
  0x55   : > { %705 = vmatpush.bf16.msra.mxu1 %v1670_v13  ;;  %v1654_v24 = vor.u32 %v1941_v20, %v1651_v21  ;;  %v1938_v25 = vld [vmem:[#allocation11 + $0x34] sm:$0xf0]  ;;  %v1939_v26 = vld [vmem:[#allocation11 + $0x44] sm:$0xf]  ;;  %v1643_v27 = vld [vmem:[#allocation11 + $0x48] sm:$0xf0] }
  0x56   : > { %v1634_v28 = vor.u32 %v1938_v25, %v1633_v23  ;;  %v1625_v29 = vld [vmem:[#allocation11 + $0x20] sm:$0xf]  ;;  %v1646_v30 = vor.u32 %v1939_v26, %v1643_v27  ;;  %v1936_v31 = vld [vmem:[#allocation11 + $0x24] sm:$0xf0]  ;;  %v1937_v32 = vld [vmem:[#allocation11 + $0x34] sm:$0xf] }
  0x57   : > { %693 = vmatpush.bf16.msra.mxu0 %v1658_v8  ;;  %v1635_v33 = vld [vmem:[#allocation11 + $0x38] sm:$0xf0]  ;;  %v1626_v34 = vor.u32 %v1936_v31, %v1625_v29  ;;  %v1617_v35 = vld [vmem:[#allocation11 + $0x10] sm:$0xf]  ;;  %v1934_v37 = vld [vmem:[#allocation11 + $0x14] sm:$0xf0] }
  0x58   : > { %v1638_v36 = vor.u32 %v1937_v32, %v1635_v33  ;;  %v1935_v38 = vld [vmem:[#allocation11 + $0x24] sm:$0xf]  ;;  %v1627_v39 = vld [vmem:[#allocation11 + $0x28] sm:$0xf0]  ;;  %v1618_v40 = vor.u32 %v1934_v37, %v1617_v35  ;;  %v1609_v41 = vld [vmem:[#allocation11] sm:$0xf] }
  0x59   : > { %706 = vmatpush.bf16.msra.mxu1 %v1662_v18  ;;  %v1630_v42 = vor.u32 %v1935_v38, %v1627_v39  ;;  %v1932_v43 = vld [vmem:[#allocation11 + $0x4] sm:$0xf0]  ;;  %v1933_v44 = vld [vmem:[#allocation11 + $0x14] sm:$0xf]  ;;  %v1619_v45 = vld [vmem:[#allocation11 + $0x18] sm:$0xf0] }
  0x5a   : > { %v1610_v46 = vor.u32 %v1932_v43, %v1609_v41  ;;  %v1622_v47 = vor.u32 %v1933_v44, %v1619_v45  ;;  %v1931_v48 = vld [vmem:[#allocation11 + $0x4] sm:$0xf]  ;;  %v1611_v49 = vld [vmem:[#allocation11 + $0x8] sm:$0xf0]  ;;  %v1954_v51 = vld [vmem:[#allocation12 + $0x38] sm:$0xff] }
  0x5b   : > { %694 = vmatpush.bf16.msra.mxu0 %v1650_v16  ;;  %v1614_v50 = vor.u32 %v1931_v48, %v1611_v49  ;;  %804 = vmatpush.bf16.msra.mxu2 %v1954_v51  ;;  %v1953_v52 = vld [vmem:[#allocation12 + $0x30] sm:$0xff]  ;;  %v1952_v53 = vld [vmem:[#allocation12 + $0x28] sm:$0xff]  ;;  %v1951_v54 = vld [vmem:[#allocation12 + $0x20] sm:$0xff] }
  0x5c   : > { %v1950_v55 = vld [vmem:[#allocation12 + $0x18] sm:$0xff]  ;;  %v1949_v56 = vld [vmem:[#allocation12 + $0x10] sm:$0xff]  ;;  %v1948_v57 = vld [vmem:[#allocation12 + $0x8] sm:$0xff] }
  0x5d   : > { %707 = vmatpush.bf16.msra.mxu1 %v1654_v24  ;;  %v1947_v58 = vld [vmem:[#allocation12] sm:$0xff] }
  0x5f   : > { %695 = vmatpush.bf16.msra.mxu0 %v1642_v22  ;;  %805 = vmatpush.bf16.msra.mxu2 %v1953_v52 }
  0x61   : > { %708 = vmatpush.bf16.msra.mxu1 %v1646_v30 }
  0x63   : > { %696 = vmatpush.bf16.msra.mxu0 %v1634_v28  ;;  %806 = vmatpush.bf16.msra.mxu2 %v1952_v53 }
  0x65   : > { %709 = vmatpush.bf16.msra.mxu1 %v1638_v36 }
  0x67   : > { %697 = vmatpush.bf16.msra.mxu0 %v1626_v34  ;;  %807 = vmatpush.bf16.msra.mxu2 %v1951_v54 }
  0x69   : > { %710 = vmatpush.bf16.msra.mxu1 %v1630_v42 }
  0x6b   : > { %698 = vmatpush.bf16.msra.mxu0 %v1618_v40  ;;  %808 = vmatpush.bf16.msra.mxu2 %v1950_v55 }
  0x6d   : > { %711 = vmatpush.bf16.msra.mxu1 %v1622_v47 }
  0x6f   : > { %699 = vmatpush.bf16.msra.mxu0 %v1610_v46  ;;  %809 = vmatpush.bf16.msra.mxu2 %v1949_v56 }
  0x71   : > { %712 = vmatpush.bf16.msra.mxu1 %v1614_v50 }
  0x72   : > { %700 = vmatmul.bf16.vlgmr.msra.gmra.mxu0 %v2700_v0 }
  0x73   : > { %810 = vmatpush.bf16.msra.mxu2 %v1948_v57 }
  0x74   : > { %713 = vmatmul.bf16.vlgmr.msra.gmra.mxu1 %v2700_v0 }
  0x77   : > { %811 = vmatpush.bf16.msra.mxu2 %v1947_v58 }
  0xef   : > { %v701_v59 = vpop.f32.mrf.mxu0 }
  0xf0   : > { %v1671_v60 = vmul.f32 -1.442695, %v701_v59 }
  0xf1   : > { %v714_v61 = vpop.f32.mrf.mxu1 }
  0xf2   : > { %2150 = vpow2.f32 %v1671_v60 }
  0xf7   : > { %v703_v62 = vpop.f32.mrf.mxu0 }
  0xf8   : > { %v2151_v63 = vpop.eup %2150 }
  0xf9   : > { %v721_v3 = vadd.f32 1.0, %v2151_v63  ;;  %v716_v4 = vpop.f32.mrf.mxu1 }
  0xfb   : > { %2152 = vrcp.f32 %v721_v3  ;;  %v733_v8 = vand.u32 2147483648, %v721_v3  ;;  %v731_v10 = vand.u32 2147483647, %v721_v3  ;;  %vm727_vm1 = vweird.f32 %v721_v3 }
  0xfd   : > { %v734_v12 = vor.u32 1.1754944e-38, %v733_v8  ;;  %vm732_vm3 = vcmp.eq.f32.partialorder %v731_v10, 8.507059e+37 }
 0x101   : > { %v2153_v5 = vpop.eup %2152 }
 0x102   : > { %v723_v6 = vmul.f32 %v2153_v5, %v721_v3  ;;  %vm728_vm0 = vweird.f32 %v2153_v5 }
 0x103   : > { %vm729_vm2 = vmor %vm727_vm1, %vm728_vm0 }
 0x104   : > { %v724_v7 = vsub.f32 1.0, %v723_v6 }
 0x106   : > { %v725_v9 = vmul.f32 %v2153_v5, %v724_v7 }
 0x108   : > { %v726_v11 = vadd.f32 %v2153_v5, %v725_v9 }
 0x10a   : > { %v730_v13 = vsel %vm729_vm2, %v2153_v5, %v726_v11 }
 0x10b   : > { %v735_v14 = vsel %vm732_vm3, %v734_v12, %v730_v13 }
 0x10c   : > { %v737_v15 = vmul.f32 %v735_v14, %v701_v59 }
 0x10e   : > { %v738_v16 = vmul.f32 %v737_v15, %v714_v61 }
 0x110   : > { %v739_v17 = vpack.c.bf16 %v738_v16, %v738_v16 }
 0x112   : > { %812 = vmatmul.bf16.vlgmr.msra.gmra.mxu2 %v739_v17 }
 0x195   : > { %v813_v18 = vpop.f32.mrf.mxu2 }
 0x196   : > { %817 = vst [vmem:[#allocation2] sm:$0xff] %v813_v18 }
 0x19d   : > { %v815_v19 = vpop.f32.mrf.mxu2 }
 0x19e PF: > { %s2712_s12 = sshll.u32 %s2438_s24, 6  ;;  %s1955_s15 = sshll.u32 %s2438_s24, 7  ;;  %v2465_v20 = vmov 0   ;;  %v2466_v21 = vmov 16   ;;  %v2467_v34 = vmov 8   ;;  %v2468_v35 = vmov 24  }
 0x19f   : > { %2154 = vset.pattern.permute.xlu0 %v2465_v20  ;;  %2156 = vset.pattern.permute.xlu1 %v2466_v21  ;;  %s2917_s10 = sld [smem:[#allocation24_spill]]  ;;  %s2756_s6 = scalar_lea.vmem [#allocation9], %s2712_s12  ;;  %vm1003_vm4 = vcmask 523264  }
 0x1a0   : > { %s2918_s8 = sld [smem:[#allocation22_spill]]  ;;  %824 = vperm.xlu0 %2154, %v2702_v1   ;;  %838 = vperm.xlu1 %2156, %v2702_v1   ;;  %v1768_v55 = vld [vmem:[%s2756_s6 + $0x30] sm:$0xf]  ;;  %v1989_v56 = vld [vmem:[%s2756_s6 + $0x34] sm:$0xf0]  ;;  %s1704_s7 = sshll.u32 %s2438_s24, 2 }
 0x1a1   : > { %2158 = vset.pattern.permute.xlu2 %v2465_v20  ;;  %v1760_v57 = vld [vmem:[%s2756_s6 + $0x20] sm:$0xf]  ;;  %v1769_v58 = vor.u32 %v1989_v56, %v1768_v55  ;;  %v1987_v59 = vld [vmem:[%s2756_s6 + $0x24] sm:$0xf0]  ;;  %v1988_v60 = vld [vmem:[%s2756_s6 + $0x34] sm:$0xf] }
 0x1a2   : > { %1375 = vperm.xlu2 %2158, %v2704_v2   ;;  %v1761_v61 = vor.u32 %v1987_v59, %v1760_v57  ;;  %v1752_v62 = vld [vmem:[%s2756_s6 + $0x10] sm:$0xf]  ;;  %v1770_v63 = vld [vmem:[%s2756_s6 + $0x38] sm:$0xf0]  ;;  %v1985_v3 = vld [vmem:[%s2756_s6 + $0x14] sm:$0xf0] }
 0x1a3   : > { %1011 = vmatpush.bf16.msra.mxu1 %v1769_v58  ;;  %v1773_v4 = vor.u32 %v1988_v60, %v1770_v63  ;;  %v1986_v5 = vld [vmem:[%s2756_s6 + $0x24] sm:$0xf]  ;;  %v1762_v6 = vld [vmem:[%s2756_s6 + $0x28] sm:$0xf0]  ;;  %v1753_v8 = vor.u32 %v1985_v3, %v1752_v62  ;;  %v1984_v9 = vld [vmem:[%s2756_s6 + $0x14] sm:$0xf] }
 0x1a4   : > { %v1765_v7 = vor.u32 %v1986_v5, %v1762_v6  ;;  %v1754_v10 = vld [vmem:[%s2756_s6 + $0x18] sm:$0xf0]  ;;  %v1744_v11 = vld [vmem:[%s2756_s6] sm:$0xf]  ;;  %v1983_v12 = vld [vmem:[%s2756_s6 + $0x4] sm:$0xf0] }
 0x1a5   : > { %s2719_s11 = scalar_lea.vmem %s2917_s10, %s2712_s12  ;;  %1024 = vmatpush.bf16.msra.mxu2 %v1773_v4  ;;  %v1757_v15 = vor.u32 %v1984_v9, %v1754_v10  ;;  %s819_s29 = scalar_lea.vmem [#allocation6], %s1704_s7  ;;  %v1745_v17 = vor.u32 %v1983_v12, %v1744_v11 }
 0x1a6   : > { %s2724_s9 = scalar_lea.vmem %s2918_s8, %s1955_s15  ;;  %v1980_v22 = vld [vmem:[%s2719_s11 + $0x38] sm:$0xff]  ;;  %v1979_v28 = vld [vmem:[%s2719_s11 + $0x30] sm:$0xff]  ;;  %v1978_v32 = vld [vmem:[%s2719_s11 + $0x28] sm:$0xff]  ;;  %s2919_s17 = sld [smem:[#allocation26_spill]] }
 0x1a7   : > { %v1834_v23 = vld [vmem:[%s2724_s9 + $0x70] sm:$0xf]  ;;  %v1971_v24 = vld [vmem:[%s2724_s9 + $0x74] sm:$0xf0]  ;;  %v1826_v26 = vld [vmem:[%s2724_s9 + $0x60] sm:$0xf]  ;;  %938 = vmatpush.bf16.msra.mxu0 %v1980_v22  ;;  %1012 = vmatpush.bf16.msra.mxu1 %v1761_v61 }
 0x1a8   : > { %v1835_v25 = vor.u32 %v1971_v24, %v1834_v23  ;;  %v1969_v27 = vld [vmem:[%s2724_s9 + $0x64] sm:$0xf0]  ;;  %v1818_v30 = vld [vmem:[%s2724_s9 + $0x50] sm:$0xf]  ;;  %v1967_v31 = vld [vmem:[%s2724_s9 + $0x54] sm:$0xf0]  ;;  %2155 = vset.pattern.permute.xlu0 %v2467_v34  ;;  %2157 = vset.pattern.permute.xlu1 %v2468_v35 }
 0x1a9   : > { %v1827_v29 = vor.u32 %v1969_v27, %v1826_v26  ;;  %v1819_v33 = vor.u32 %v1967_v31, %v1818_v30  ;;  %831 = vperm.xlu0 %2155, %v2702_v1   ;;  %845 = vperm.xlu1 %2157, %v2702_v1   ;;  %v1810_v2 = vld [vmem:[%s2724_s9 + $0x40] sm:$0xf]  ;;  %v1965_v36 = vld [vmem:[%s2724_s9 + $0x44] sm:$0xf0]  ;;  %v1802_v39 = vld [vmem:[%s2724_s9 + $0x30] sm:$0xf]  ;;  %v821_v27 = vunpack.c.l.bf16 %v2700_v0 }
 0x1aa   : > { %1113 = vmatpush.bf16.msra.mxu3 %v1835_v25  ;;  %v1977_v37 = vld [vmem:[%s2719_s11 + $0x20] sm:$0xff]  ;;  %v1811_v38 = vor.u32 %v1965_v36, %v1810_v2  ;;  %v1963_v40 = vld [vmem:[%s2724_s9 + $0x34] sm:$0xf0]  ;;  %v1961_v44 = vld [vmem:[%s2724_s9 + $0x24] sm:$0xf0]  ;;  %1025 = vmatpush.bf16.msra.mxu2 %v1765_v7  ;;  %s2803_s10 = scalar_lea.vmem [#allocation8], %s2712_s12 }
 0x1ab   : > { %939 = vmatpush.bf16.msra.mxu0 %v1979_v28  ;;  %v1976_v41 = vld [vmem:[%s2719_s11 + $0x18] sm:$0xff]  ;;  %v1803_v42 = vor.u32 %v1963_v40, %v1802_v39  ;;  %v1794_v43 = vld [vmem:[%s2724_s9 + $0x20] sm:$0xf]  ;;  %v1975_v45 = vld [vmem:[%s2719_s11 + $0x10] sm:$0xff]  ;;  %1013 = vmatpush.bf16.msra.mxu1 %v1753_v8  ;;  %s2920_s18 = sld [smem:[#allocation27_spill]]  ;;  %p1926_p9 = scmp.ne.s32.totalorder %s2438_s24, 1 }
 0x1ac   : > { %v1795_v46 = vor.u32 %v1961_v44, %v1794_v43  ;;  %v1786_v47 = vld [vmem:[%s2724_s9 + $0x10] sm:$0xf]  ;;  %v1959_v48 = vld [vmem:[%s2724_s9 + $0x14] sm:$0xf0]  ;;  %v1974_v49 = vld [vmem:[%s2719_s11 + $0x8] sm:$0xff]  ;;  %s2799_s5 = scalar_lea.vmem %s2919_s17, %s2712_s12  ;;  %s2008_s12 = sshll.u32 %s2438_s24, 5 }
 0x1ad   : > { %v1787_v50 = vor.u32 %v1959_v48, %v1786_v47  ;;  %v1778_v51 = vld [vmem:[%s2724_s9] sm:$0xf]  ;;  %v1957_v52 = vld [vmem:[%s2724_s9 + $0x4] sm:$0xf0]  ;;  %v1970_v13 = vld [vmem:[%s2724_s9 + $0x74] sm:$0xf] }
 0x1ae   : > { %1114 = vmatpush.bf16.msra.mxu3 %v1827_v29  ;;  %v1973_v53 = vld [vmem:[%s2719_s11] sm:$0xff]  ;;  %v1779_v54 = vor.u32 %v1957_v52, %v1778_v51  ;;  %v1836_v14 = vld [vmem:[%s2724_s9 + $0x78] sm:$0xf0]  ;;  %v1828_v22 = vld [vmem:[%s2724_s9 + $0x68] sm:$0xf0]  ;;  %1026 = vmatpush.bf16.msra.mxu2 %v1757_v15 }
 0x1af   : > { %940 = vmatpush.bf16.msra.mxu0 %v1978_v32  ;;  %v820_v16 = vld [vmem:[%s819_s29] sm:$0xf]  ;;  %v1968_v21 = vld [vmem:[%s2724_s9 + $0x64] sm:$0xf]  ;;  %1014 = vmatpush.bf16.msra.mxu1 %v1745_v17  ;;  %v1966_v25 = vld [vmem:[%s2724_s9 + $0x54] sm:$0xf] }
 0x1b0   : > { %v827_v23 = vperm.slane %v820_v16, 0  ;;  %v1831_v24 = vor.u32 %v1968_v21, %v1828_v22  ;;  %v1820_v26 = vld [vmem:[%s2724_s9 + $0x58] sm:$0xf0]  ;;  %v834_v29 = vperm.slane %v820_v16, 1  ;;  %v841_v30 = vperm.slane %v820_v16, 2  ;;  %v2006_v6 = vld [vmem:[%s2799_s5 + $0x30] sm:$0xff] }
 0x1b1   : > { %2159 = vset.pattern.permute.xlu0 %v2465_v20  ;;  %v1839_v20 = vor.u32 %v1970_v13, %v1836_v14  ;;  %v848_v31 = vperm.slane %v820_v16, 3  ;;  %v1823_v32 = vor.u32 %v1966_v25, %v1820_v26  ;;  %v1964_v43 = vld [vmem:[%s2724_s9 + $0x44] sm:$0xf]  ;;  %v1962_v47 = vld [vmem:[%s2724_s9 + $0x34] sm:$0xf]  ;;  %v2007_v4 = vld [vmem:[%s2799_s5 + $0x38] sm:$0xff]  ;;  %s2824_s8 = scalar_lea.vmem %s2920_s18, %s2008_s12 }
 0x1b2   : > { %1115 = vmatpush.bf16.msra.mxu3 %v1819_v33  ;;  %v1804_v48 = vld [vmem:[%s2724_s9 + $0x38] sm:$0xf0]  ;;  %v1796_v51 = vld [vmem:[%s2724_s9 + $0x28] sm:$0xf0]  ;;  %v1956_v56 = vld [vmem:[%s2724_s9 + $0x4] sm:$0xf] }
 0x1b3   : > { %941 = vmatpush.bf16.msra.mxu0 %v1977_v37  ;;  %1126 = vmatpush.bf16.msrb.mxu1 %v1839_v20  ;;  %v1780_v57 = vld [vmem:[%s2724_s9 + $0x8] sm:$0xf0]  ;;  %v1998_v5 = vld [vmem:[%s2803_s10 + $0x38] sm:$0xff]  ;;  %v1997_v7 = vld [vmem:[%s2803_s10 + $0x30] sm:$0xff] }
 0x1b4   : > { %v1783_v58 = vor.u32 %v1956_v56, %v1780_v57  ;;  %v2005_v8 = vld [vmem:[%s2799_s5 + $0x28] sm:$0xff]  ;;  %v2004_v10 = vld [vmem:[%s2799_s5 + $0x20] sm:$0xff]  ;;  %v2003_v12 = vld [vmem:[%s2799_s5 + $0x18] sm:$0xff] }
 0x1b5   : > { %v1996_v9 = vld [vmem:[%s2803_s10 + $0x28] sm:$0xff]  ;;  %v1995_v11 = vld [vmem:[%s2803_s10 + $0x20] sm:$0xff]  ;;  %v1994_v13 = vld [vmem:[%s2803_s10 + $0x18] sm:$0xff] }
 0x1b6   : > { %1116 = vmatpush.bf16.msra.mxu3 %v1811_v38  ;;  %v2002_v14 = vld [vmem:[%s2799_s5 + $0x10] sm:$0xff]  ;;  %v2001_v16 = vld [vmem:[%s2799_s5 + $0x8] sm:$0xff]  ;;  %v1991_v20 = vld [vmem:[%s2803_s10] sm:$0xff] }
 0x1b7   : > { %942 = vmatpush.bf16.msra.mxu0 %v1976_v41  ;;  %1127 = vmatpush.bf16.msrb.mxu1 %v1831_v24  ;;  %v1982_v41 = vld [vmem:[%s2756_s6 + $0x4] sm:$0xf]  ;;  %v1993_v15 = vld [vmem:[%s2803_s10 + $0x10] sm:$0xff]  ;;  %v1992_v17 = vld [vmem:[%s2803_s10 + $0x8] sm:$0xff] }
 0x1b8   : > { %v2011_v25 = vld [vmem:[%s2824_s8 + $0x10] sm:$0xff] }
 0x1ba   : > { %1117 = vmatpush.bf16.msra.mxu3 %v1803_v42  ;;  %v1746_v42 = vld [vmem:[%s2756_s6 + $0x8] sm:$0xf0] }
 0x1bb   : > { %943 = vmatpush.bf16.msra.mxu0 %v1975_v45  ;;  %1128 = vmatpush.bf16.msrb.mxu1 %v1823_v32  ;;  %v1749_v44 = vor.u32 %v1982_v41, %v1746_v42  ;;  %v1812_v45 = vld [vmem:[%s2724_s9 + $0x48] sm:$0xf0] }
 0x1bd   : > { %1027 = vmatpush.bf16.msra.mxu2 %v1749_v44 }
 0x1be   : > { %1118 = vmatpush.bf16.msra.mxu3 %v1795_v46  ;;  %v1815_v46 = vor.u32 %v1964_v43, %v1812_v45  ;;  %v2009_v45 = vld [vmem:[%s2824_s8] sm:$0xff] }
 0x1bf   : > { %944 = vmatpush.bf16.msra.mxu0 %v1974_v49  ;;  %v1807_v49 = vor.u32 %v1962_v47, %v1804_v48 }
 0x1c0   : > { %1129 = vmatpush.bf16.msrb.mxu1 %v1815_v46 }
 0x1c1   : > { %1245 = vmatpush.bf16.msrb.mxu2 %v2007_v4 }
 0x1c2   : > { %1119 = vmatpush.bf16.msra.mxu3 %v1787_v50  ;;  %v1960_v50 = vld [vmem:[%s2724_s9 + $0x24] sm:$0xf] }
 0x1c3   : > { %945 = vmatpush.bf16.msra.mxu0 %v1973_v53  ;;  %v1799_v52 = vor.u32 %v1960_v50, %v1796_v51  ;;  %v1958_v53 = vld [vmem:[%s2724_s9 + $0x14] sm:$0xf] }
 0x1c4   : > { %1130 = vmatpush.bf16.msrb.mxu1 %v1807_v49 }
 0x1c5   : > { %1246 = vmatpush.bf16.msrb.mxu2 %v2006_v6 }
 0x1c6   : > { %1120 = vmatpush.bf16.msra.mxu3 %v1779_v54  ;;  %v1788_v54 = vld [vmem:[%s2724_s9 + $0x18] sm:$0xf0] }
 0x1c7   : > { %v1791_v55 = vor.u32 %v1958_v53, %v1788_v54 }
 0x1c8   : > { %1131 = vmatpush.bf16.msrb.mxu1 %v1799_v52 }
 0x1c9   : > { %1247 = vmatpush.bf16.msrb.mxu2 %v2005_v8 }
 0x1ca   : > { %1359 = vmatpush.bf16.msrb.mxu3 %v1998_v5 }
 0x1cc   : > { %1132 = vmatpush.bf16.msrb.mxu1 %v1791_v55  ;;  %v1372_v55 = vld [vmem:[#allocation2] sm:$0xff] }
 0x1cd   : > { %1248 = vmatpush.bf16.msrb.mxu2 %v2004_v10 }
 0x1ce   : > { %1360 = vmatpush.bf16.msrb.mxu3 %v1997_v7 }
 0x1d0   : > { %1133 = vmatpush.bf16.msrb.mxu1 %v1783_v58 }
 0x1d1   : > { %1249 = vmatpush.bf16.msrb.mxu2 %v2003_v12 }
 0x1d2   : > { %1361 = vmatpush.bf16.msrb.mxu3 %v1996_v9 }
 0x1d5   : > { %1250 = vmatpush.bf16.msrb.mxu2 %v2002_v14 }
 0x1d6   : > { %1362 = vmatpush.bf16.msrb.mxu3 %v1995_v11 }
 0x1d9   : > { %1251 = vmatpush.bf16.msrb.mxu2 %v2001_v16 }
 0x1da   : > { %1363 = vmatpush.bf16.msrb.mxu3 %v1994_v13 }
 0x1de   : > { %1364 = vmatpush.bf16.msrb.mxu3 %v1993_v15 }
 0x1e2   : > { %1365 = vmatpush.bf16.msrb.mxu3 %v1992_v17 }
 0x1e6   : > { %1366 = vmatpush.bf16.msrb.mxu3 %v1991_v20 }
 0x1fc   : > { %v1376_v53 = vpop.permute.xlu2 %1375 }
 0x212   : > { %v825_v18 = vpop.permute.xlu0 %824  ;;  %v839_v19 = vpop.permute.xlu1 %838 }
 0x213   : > { %v828_v28 = vmul.f32 %v827_v23, %v825_v18  ;;  %v842_v36 = vmul.f32 %v841_v30, %v839_v19  ;;  %v2000_v19 = vld [vmem:[%s2799_s5] sm:$0xff]  ;;  %v2012_v23 = vld [vmem:[%s2824_s8 + $0x18] sm:$0xff] }
 0x214   : > { %1252 = vmatpush.bf16.msrb.mxu2 %v2000_v19  ;;  %1302 = vmatpush.bf16.msrb.mxu0 %v2012_v23 }
 0x215   : > { %v829_v35 = vadd.f32 %v828_v28, %v821_v27  ;;  %v2010_v28 = vld [vmem:[%s2824_s8 + $0x8] sm:$0xff] }
 0x218   : > { %1303 = vmatpush.bf16.msrb.mxu0 %v2011_v25 }
 0x21b   : > { %v832_v33 = vpop.permute.xlu0 %831  ;;  %v846_v34 = vpop.permute.xlu1 %845 }
 0x21c   : > { %v835_v2 = vmul.f32 %v834_v29, %v832_v33  ;;  %v849_v38 = vmul.f32 %v848_v31, %v846_v34  ;;  %1304 = vmatpush.bf16.msrb.mxu0 %v2010_v28 }
 0x21e   : > { %v836_v37 = vadd.f32 %v835_v2, %v829_v35 }
 0x220   : > { %v843_v0 = vadd.f32 %v842_v36, %v836_v37  ;;  %1305 = vmatpush.bf16.msrb.mxu0 %v2009_v45 }
 0x222   : > { %v850_v39 = vadd.f32 %v849_v38, %v843_v0 }
 0x224   : > { %v851_v40 = vpack.c.bf16 %v850_v39, %v850_v39 }
 0x226   : > { %946 = vmatmul.bf16.vlgmr.msra.gmra.mxu0 %v851_v40  ;;  %1121 = vmatmul.bf16.vlgmr.msra.gmra.mxu3 %v851_v40 }
 0x2a3   : > { %v947_v59 = vpop.f32.mrf.mxu0 }
 0x2a4   : > { %v951_v60 = vmul.f32 %v947_v59, %v2702_v1 }
 0x2a6   : > { %v952_v61 = vpack.c.bf16 %v951_v60, %v951_v60 }
 0x2a8   : > { %1774 = vmatmul.msk.bf16.vlgmr.msra.gmra.mxu1 %vm1003_vm4, %v952_v61  ;;  %1775 = vmatmul.msk.bf16.vlgmr.msra.gmra.mxu2 %vm1003_vm4, %v952_v61 }
 0x2a9   : > { %v1122_v62 = vpop.f32.mrf.mxu3 }
 0x2ab   : > { %v949_v63 = vpop.f32.mrf.mxu0 }
 0x2b1   : > { %v1124_v3 = vpop.f32.mrf.mxu3 }
 0x2b8   : > { %1134 = vmatmul.bf16.vlgmr.msrb.gmra.mxu1 %v851_v40 }
 0x325   : > { %v1016_v18 = vpop.f32.mrf.mxu1 }
 0x326   : > { %v1123_v21 = vadd.f32 %v1122_v62, %v1016_v18 }
 0x328   : > { %v1840_v22 = vmul.f32 -1.442695, %v1123_v21 }
 0x32a   : > { %2160 = vpow2.f32 %v1840_v22 }
 0x32b   : > { %v1029_v24 = vpop.f32.mrf.mxu2 }
 0x32d   : > { %v1018_v26 = vpop.f32.mrf.mxu1 }
 0x330   : > { %v2161_v27 = vpop.eup %2160 }
 0x331   : > { %v1142_v29 = vadd.f32 1.0, %v2161_v27 }
 0x333   : > { %2162 = vrcp.f32 %v1142_v29  ;;  %v1031_v30 = vpop.f32.mrf.mxu2  ;;  %v1154_v35 = vand.u32 2147483648, %v1142_v29  ;;  %v1152_v37 = vand.u32 2147483647, %v1142_v29  ;;  %vm1148_vm6 = vweird.f32 %v1142_v29 }
 0x335   : > { %v1135_v31 = vpop.f32.mrf.mxu1  ;;  %v1155_v0 = vor.u32 1.1754944e-38, %v1154_v35  ;;  %vm1153_vm8 = vcmp.eq.f32.partialorder %v1152_v37, 8.507059e+37 }
 0x336   : > { %v1136_v42 = vadd.f32 %v1135_v31, %v1029_v24 }
 0x339   : > { %v2163_v32 = vpop.eup %2162 }
 0x33a   : > { %v1144_v33 = vmul.f32 %v2163_v32, %v1142_v29  ;;  %vm1149_vm5 = vweird.f32 %v2163_v32 }
 0x33b   : > { %vm1150_vm7 = vmor %vm1148_vm6, %vm1149_vm5 }
 0x33c   : > { %v1145_v34 = vsub.f32 1.0, %v1144_v33 }
 0x33d   : > { %v1137_v2 = vpop.f32.mrf.mxu1 }
 0x33e   : > { %v1146_v36 = vmul.f32 %v2163_v32, %v1145_v34 }
 0x340   : > { %v1147_v38 = vadd.f32 %v2163_v32, %v1146_v36 }
 0x342   : > { %v1151_v39 = vsel %vm1150_vm7, %v2163_v32, %v1147_v38 }
 0x343   : > { %v1156_v40 = vsel %vm1153_vm8, %v1155_v0, %v1151_v39 }
 0x344   : > { %v1158_v41 = vmul.f32 %v1156_v40, %v1123_v21 }
 0x346   : > { %v1159_v43 = vmul.f32 %v1158_v41, %v1136_v42 }
 0x348   : > { %v1160_v44 = vpack.c.bf16 %v1159_v43, %v1159_v43 }
 0x34a   : > { %1253 = vmatmul.bf16.vlgmr.msrb.gmra.mxu2 %v1160_v44  ;;  %1367 = vmatmul.bf16.vlgmr.msrb.gmra.mxu3 %v1160_v44 }
 0x3cd   : > { %v1254_v46 = vpop.f32.mrf.mxu2  ;;  %v1368_v47 = vpop.f32.mrf.mxu3 }
 0x3ce   : > { %v1258_v48 = vmul.f32 %v1254_v46, %v2702_v1 }
 0x3d0   : > { %v1259_v49 = vpack.c.bf16 %v1258_v48, %v1258_v48 }
 0x3d2   : > { %1893 = vmatmul.msk.bf16.vlgmr.msrb.gmra.mxu0 %vm1003_vm4, %v1259_v49 }
 0x3d5   : > { %v1256_v50 = vpop.f32.mrf.mxu2  ;;  %v1370_v51 = vpop.f32.mrf.mxu3 }
 0x44f   : > { %v1307_v52 = vpop.f32.mrf.mxu0 }
 0x450   : > { %v1369_v54 = vadd.f32 %v1368_v47, %v1307_v52 }
 0x452   : > { %v1378_v56 = vmul.f32 %v1376_v53, %v1369_v54 }
 0x453   : > { %1384 = sbr.rel (%p1926_p9) target bundleno = 1121 (0x461), region = 100 }
 0x454   : > { %v1379_v57 = vadd.f32 %v1378_v56, %v1372_v55 }
 0x456   : > { %1380 = vst [vmem:[#allocation2] sm:$0xff] %v1379_v57 }
 0x457   : > { %v1309_v58 = vpop.f32.mrf.mxu0 }
 0x45d   : > { %v1385_v59 = vld [vmem:[#allocation2] sm:$0xff] }
 0x45e   : > { %v1386_v60 = vpack.c.bf16 %v1385_v59, %v1385_v59 }
 0x460   : > { %1387 = vst [vmem:[%s2706_s3] sm:$0xf] %v1386_v60 }
 0x461 PF: > { %s1928_s9 = sshll.u32 %s2442_s25, 2  ;;  %s2921_s29 = sld [smem:[#allocation30_spill]] }
 0x462   : > { %s1401_s15 = sshll.u32 %s2706_s3, 4  ;;  %s1389_s24 = scalar_lea.sflag [#allocation5], %s2670_s13  ;;  %s1402_s15 = int_to_ptr.vmem [resolvable:$true] %s1401_s15 }
 0x467   : > { %s1399_s30 = scalar_lea.hbm %s2921_s29, %s1928_s9  ;;  %s2364_s25 = scalar_lea.hbm %s2921_s29, 8 }
 0x468   : > { %s1403_s17 = sshll.u32 %s1399_s30, 4  ;;  %s1404_s17 = int_to_ptr.hbm [resolvable:$true] %s1403_s17 }
 0x469   : > { %s2358_s5 = sshra.s32 %s1404_s17, 4  ;;  %s2359_s5 = int_to_ptr.hbm [resolvable:$true] %s2358_s5 }
 0x46a   : > { %s2360_s10 = scalar_lea.hbm %s2359_s5, 4  ;;  %p2365_p13 = scmp.lt.s32.totalorder %s2359_s5, %s2921_s29 }
 0x46b   : > { %p2361_p10 = scmp.ne.s32.totalorder %s2359_s5, %s2360_s10  ;;  %p2366_p0 = scmp.lt.s32.totalorder %s2364_s25, %s2360_s10 }
 0x46d   : > { %p2362_p11 = pnand %p2361_p10, %p2646_p2  ;;  %p2367_p5 = por %p2366_p0, %p2365_p13 }
 0x46f   : > { %p2363_p12 = pneg %p2362_p11 }
 0x471   : > { %p2368_p6 = pnand %p2367_p5, %p2363_p12 }
 0x473   : > { %2371 = shalt.err (!%p2368_p6)
}
 0x474   : > { %2035 = dma.vmem_to_hbm [thread:$0]  (%p2646_p2), %s1402_s15, 64, %s1404_s17, %s1389_s24  }
 0x475 PF: > { %p2072_p7 = scmp.ge.s32.totalorder %s2454_s28, 2  ;;  %s1415_s13 = sand.u32 1, %s2426_s21  }
 0x476   : > { %s1416_s3 = scalar_lea.sflag [#allocation5], %s1415_s13 }
 0x477   : > { %p2058_p3 = pnand %p2072_p7, %p2650_p4 }
 0x479   : > { %p2059_p8 = pneg %p2058_p3 }
 0x47b   : > { %2421 = dma.done.wait (%p2059_p8), %s1416_s3, 64  }
 0x47c   : > { %2423 = vsyncadd (%p2059_p8), %s1416_s3, 4294967232  ;;  %s31_s28 = sadd.s32 1, %s2454_s28   ;;  %s2922_s19 = sld [smem:[#allocation20_spill]] }
 0x47d   : > { %p28_p1 = scmp.ge.s32.totalorder %s31_s28, 6   ;;  %s2923_s21 = smov %s2430_s22 }
 0x47e   : > { %s2924_s22 = smov %s2434_s23  ;;  %s2925_s23 = smov %s2659_s20 }
 0x47f   : > { %s2926_s24 = smov %s2446_s26  ;;  %s2927_s25 = smov %s2450_s27 }
 0x480   : > { %s2929_s27 = smov %s2935_s4  ;;  %30 = sbr.rel (!%p28_p1) target bundleno = 21 (0x15), region = 154 }
 0x482   : > { %s2928_s26 = smov %s2922_s19 }
 0x485   :  { %1422 = vsyncpa [#allocation4], 1 }
 0x486   :  { %1424 = vsyncpa [#allocation4 + $0x1], 1 }
 0x487   :  { %1425 = vsyncpa [#allocation7], 1 }
 0x488   :  { %1426 = vsyncpa [#allocation10], 1 }
 0x489   :  { %1427 = vsyncpa [#allocation13], 1 }
 0x48a   :  { %1428 = vsyncpa [#allocation5], 1 }
 0x48b   :  { %1430 = vsyncpa [#allocation5 + $0x1], 1 }

</bundles_post_ra>
